<compile_context>
chip_gen: v6e
topology: v6e:2x2x1
jax: 0.10.0
libtpu: 0.0.40
codegen_flags: <defaults>
</compile_context>

<pallas_src>
import jax
import jax.numpy as jnp
from jax.experimental import pallas as pl
from jax.experimental.pallas import tpu as pltpu

# ----- model hyper-parameters ------------------------------------------------
CONTEXT_LENGTH = 2
CITING_SIZE = 3
CITED_SIZE = 4
BERT_SIZE = 128
BATCH = 64

CTX_IN = CONTEXT_LENGTH * BERT_SIZE                      # 256
MC_IN = CITING_SIZE * BERT_SIZE                          # 384
MD_IN = CITED_SIZE * BERT_SIZE                           # 512
CITING_IN = CTX_IN + MC_IN                               # 640
CITED_IN = MD_IN                                         # 512
K_FUSED = CITING_IN + CITED_IN                           # 1152
EMB = 2 * BERT_SIZE                                      # 256


def _round_up(x, m):
    return (x + m - 1) // m * m


def _num_tensorcores():
    """2 TensorCores on v7x, otherwise 1 (v5e/v6e). Robust to odd device kinds."""
    try:
        kind = jax.devices()[0].device_kind.lower()
        if "v7" in kind or "7x" in kind:
            return 2
    except Exception:
        pass
    return 1


def _choose_tiling(B):
    n_cores = _num_tensorcores()
    if n_cores <= 1 or B < 2 * 128:
        # Single-TC chip (or tiny batch): one big tile, one grid step.
        return _round_up(B, 16), 1
    # v7x: exactly one large tile per TensorCore; keep lane/sublane legality.
    tm = _round_up(-(-B // n_cores), 128)
    n_tiles = max(-(-B // tm), 1)
    return tm, n_tiles


def _net_kernel(ctx_ref, mc_ref, md_ref, w_ref, b_ref, out_ref):
    # Three partial dots against static row-slices of the resident fused weight
    # (citing_emb - cited_emb) accumulated in f32 on the MXU.
    acc = jnp.dot(ctx_ref[...], w_ref[0:CTX_IN, :],
                  preferred_element_type=jnp.float32)
    acc = acc + jnp.dot(mc_ref[...], w_ref[CTX_IN:CTX_IN + MC_IN, :],
                        preferred_element_type=jnp.float32)
    acc = acc + jnp.dot(md_ref[...], w_ref[CTX_IN + MC_IN:K_FUSED, :],
                        preferred_element_type=jnp.float32)
    diff = acc + b_ref[...]                                        # f32 (TM, EMB)
    dist = jnp.sqrt(jnp.sum(diff * diff, axis=1, keepdims=True))   # (TM, 1)
    out_ref[...] = dist.T                                          # lane-dense (1, TM)


def net_forward(context, meta_citing, meta_cited, params):
    """Pallas-backed forward pass. Returns (B,) distances."""
    B = context.shape[0]
    p, q = params["p"], params["q"]

    mc_flat = meta_citing.reshape(B, MC_IN)
    md_flat = meta_cited.reshape(B, MD_IN)

    # Fold the per-column p/q scale into the fused weight rows (tiny K x EMB op),
    # then cast the weight to bf16. Scale math is done in f32 (v5e has no bf16 VPU).
    scale = jnp.concatenate([
        jnp.ones((CTX_IN,), jnp.float32),
        jnp.repeat(p, BERT_SIZE),
        jnp.repeat(q, BERT_SIZE),
    ])
    w_scaled = (scale[:, None] * params["w_fused"]).astype(jnp.bfloat16)
    b_fused = params["b_fused"]                       # f32 (1, EMB)

    TM, n_tiles = _choose_tiling(B)
    B_pad = TM * n_tiles

    def prep(a):
        if B_pad != B:
            a = jnp.pad(a, ((0, B_pad - B), (0, 0)))
        return a.astype(jnp.bfloat16)

    ctx_b = prep(context)
    mc_b = prep(mc_flat)
    md_b = prep(md_flat)

    cost = pl.CostEstimate(
        flops=2 * B_pad * K_FUSED * EMB,
        transcendentals=0,
        bytes_accessed=2 * (B_pad * K_FUSED + K_FUSED * EMB) + 4 * (EMB + B_pad),
    )

    out = pl.pallas_call(
        _net_kernel,
        out_shape=jax.ShapeDtypeStruct((1, B_pad), jnp.float32),
        grid=(n_tiles,),
        in_specs=[
            pl.BlockSpec((TM, CTX_IN), lambda i: (i, 0)),      # activations: tiled
            pl.BlockSpec((TM, MC_IN), lambda i: (i, 0)),
            pl.BlockSpec((TM, MD_IN), lambda i: (i, 0)),
            pl.BlockSpec((K_FUSED, EMB), lambda i: (0, 0)),    # fused weight: resident
            pl.BlockSpec((1, EMB), lambda i: (0, 0)),          # fused bias: resident
        ],
        out_specs=pl.BlockSpec((1, TM), lambda i: (0, i)),     # lane-dense output
        compiler_params=pltpu.CompilerParams(
            dimension_semantics=("parallel",)),                # megacore split on v7x
        cost_estimate=cost,
    )(ctx_b, mc_b, md_b, w_scaled, b_fused)

    return out.reshape(-1)[:B]


def init_params(key):
    """Parameter init mimicking nn.Linear defaults; fused weight/bias packed once."""
    k1, k2, k3, k4, k5, k6 = jax.random.split(key, 6)
    lim_c = 1.0 / jnp.sqrt(CITING_IN)
    lim_d = 1.0 / jnp.sqrt(CITED_IN)
    # stored as (in_features, out_features) -> kernel does x @ W + b
    wc = jax.random.uniform(k1, (CITING_IN, EMB), jnp.float32, -lim_c, lim_c)
    bc = jax.random.uniform(k2, (EMB,), jnp.float32, -lim_c, lim_c)
    wd = jax.random.uniform(k3, (CITED_IN, EMB), jnp.float32, -lim_d, lim_d)
    bd = jax.random.uniform(k4, (EMB,), jnp.float32, -lim_d, lim_d)
    # PyTorch inits p/q to ones; randomize here so the scaling path is exercised.
    p = jax.random.uniform(k5, (CITING_SIZE,), jnp.float32, 0.5, 1.5)
    q = jax.random.uniform(k6, (CITED_SIZE,), jnp.float32, 0.5, 1.5)
    return {
        "wc": wc, "bc": bc, "wd": wd, "bd": bd, "p": p, "q": q,
        # init-time packing for the fused single-matmul kernel (done once)
        "w_fused": jnp.concatenate([wc, -wd], axis=0),          # (K_FUSED, EMB) f32
        "b_fused": (bc - bd).reshape(1, EMB),                   # (1, EMB) f32
    }


def net_forward_ref(context, meta_citing, meta_cited, params):
    """Pure-JAX f32 reference mirroring the PyTorch forward (unfused)."""
    p, q = params["p"], params["q"]
    mc = meta_citing * p[None, :, None]
    md = meta_cited * q[None, :, None]
    citing = jnp.concatenate([context, mc.reshape(mc.shape[0], -1)], axis=1)
    cited = md.reshape(md.shape[0], -1)
    ce = citing @ params["wc"] + params["bc"]
    de = cited @ params["wd"] + params["bd"]
    return jnp.sqrt(jnp.sum((ce - de) ** 2, axis=1))


if __name__ == "__main__":
    key = jax.random.PRNGKey(0)
    kp, kx1, kx2, kx3 = jax.random.split(key, 4)

    params = init_params(kp)
    context = jax.random.normal(kx1, (BATCH, CTX_IN), jnp.float32)
    meta_citing = jax.random.normal(kx2, (BATCH, CITING_SIZE, BERT_SIZE), jnp.float32)
    meta_cited = jax.random.normal(kx3, (BATCH, CITED_SIZE, BERT_SIZE), jnp.float32)

    out = jax.block_until_ready(net_forward(context, meta_citing, meta_cited, params))
    ref = net_forward_ref(context, meta_citing, meta_cited, params)

    assert out.shape == (BATCH,)
    # bf16 operands -> relaxed tolerance vs the f32 reference (accumulation stays f32)
    rel_err = jnp.max(jnp.abs(out - ref) / (jnp.abs(ref) + 1e-6))
    assert rel_err < 5e-2, rel_err

    print("KERNEL_OK")
</pallas_src>

<mosaic_0001>
module attributes {stable_mosaic.version = 11 : i64} {
  func.func @_net_kernel(%arg0: i32, %arg1: memref<64x256xbf16, #tpu.memory_space<vmem>>, %arg2: memref<64x384xbf16, #tpu.memory_space<vmem>>, %arg3: memref<64x512xbf16, #tpu.memory_space<vmem>>, %arg4: memref<1152x256xbf16, #tpu.memory_space<vmem>>, %arg5: memref<1x256xf32, #tpu.memory_space<vmem>>, %arg6: memref<1x64xf32, #tpu.memory_space<vmem>>) attributes {dimension_semantics = [#tpu.dimension_semantics<parallel>], iteration_bounds = array<i64: 1>, scalar_prefetch = 0 : i64, scratch_operands = 0 : i64, tpu.core_type = #tpu.core_type<tc>, window_params = [{transform_indices = @transform_0, window_bounds = array<i64: 64, 256>}, {transform_indices = @transform_1, window_bounds = array<i64: 64, 384>}, {transform_indices = @transform_2, window_bounds = array<i64: 64, 512>}, {pipeline_mode = #tpu.pipeline_mode<synchronous>, transform_indices = @transform_3, window_bounds = array<i64: 1152, 256>}, {pipeline_mode = #tpu.pipeline_mode<synchronous>, transform_indices = @transform_4, window_bounds = array<i64: 1, 256>}, {transform_indices = @transform_5, window_bounds = array<i64: 1, 64>}]} {
    %c0 = arith.constant 0 : index
    %c0_0 = arith.constant 0 : index
    %0 = vector.load %arg1[%c0, %c0_0] : memref<64x256xbf16, #tpu.memory_space<vmem>>, vector<64x256xbf16>
    %c0_1 = arith.constant 0 : index
    %c0_2 = arith.constant 0 : index
    %1 = vector.load %arg4[%c0_1, %c0_2] : memref<1152x256xbf16, #tpu.memory_space<vmem>>, vector<256x256xbf16>
    %cst = arith.constant dense<0.000000e+00> : vector<64x256xf32>
    %2 = tpu.matmul %0, %1, %cst {dimension_numbers = #tpu.dot_dimension_numbers<[1], [0], [0], [1], [0, 0, 1, 1], [], []>} : vector<64x256xbf16>, vector<256x256xbf16>, vector<64x256xf32> -> vector<64x256xf32>
    %c0_3 = arith.constant 0 : index
    %c0_4 = arith.constant 0 : index
    %3 = vector.load %arg2[%c0_3, %c0_4] : memref<64x384xbf16, #tpu.memory_space<vmem>>, vector<64x384xbf16>
    %c256 = arith.constant 256 : index
    %c0_5 = arith.constant 0 : index
    %4 = vector.load %arg4[%c256, %c0_5] : memref<1152x256xbf16, #tpu.memory_space<vmem>>, vector<384x256xbf16>
    %cst_6 = arith.constant dense<0.000000e+00> : vector<64x256xf32>
    %5 = tpu.matmul %3, %4, %cst_6 {dimension_numbers = #tpu.dot_dimension_numbers<[1], [0], [0], [1], [0, 0, 1, 1], [], []>} : vector<64x384xbf16>, vector<384x256xbf16>, vector<64x256xf32> -> vector<64x256xf32>
    %6 = arith.addf %2, %5 : vector<64x256xf32>
    %c0_7 = arith.constant 0 : index
    %c0_8 = arith.constant 0 : index
    %7 = vector.load %arg3[%c0_7, %c0_8] : memref<64x512xbf16, #tpu.memory_space<vmem>>, vector<64x512xbf16>
    %c640 = arith.constant 640 : index
    %c0_9 = arith.constant 0 : index
    %8 = vector.load %arg4[%c640, %c0_9] : memref<1152x256xbf16, #tpu.memory_space<vmem>>, vector<512x256xbf16>
    %cst_10 = arith.constant dense<0.000000e+00> : vector<64x256xf32>
    %9 = tpu.matmul %7, %8, %cst_10 {dimension_numbers = #tpu.dot_dimension_numbers<[1], [0], [0], [1], [0, 0, 1, 1], [], []>} : vector<64x512xbf16>, vector<512x256xbf16>, vector<64x256xf32> -> vector<64x256xf32>
    %10 = arith.addf %6, %9 : vector<64x256xf32>
    %c0_11 = arith.constant 0 : index
    %c0_12 = arith.constant 0 : index
    %11 = vector.load %arg5[%c0_11, %c0_12] : memref<1x256xf32, #tpu.memory_space<vmem>>, vector<1x256xf32>
    %12 = vector.broadcast %11 : vector<1x256xf32> to vector<64x256xf32>
    %13 = arith.addf %10, %12 : vector<64x256xf32>
    %14 = arith.mulf %13, %13 : vector<64x256xf32>
    %cst_13 = arith.constant dense<0.000000e+00> : vector<64xf32>
    %15 = vector.multi_reduction <add>, %14, %cst_13 [1] : vector<64x256xf32> to vector<64xf32>
    %16 = vector.shape_cast %15 : vector<64xf32> to vector<64x1xf32>
    %17 = math.sqrt %16 : vector<64x1xf32>
    %18 = tpu.transpose %17, [1, 0] : vector<64x1xf32> -> vector<1x64xf32>
    %c0_14 = arith.constant 0 : index
    %c0_15 = arith.constant 0 : index
    %19 = vector.load %arg6[%c0_14, %c0_15] : memref<1x64xf32, #tpu.memory_space<vmem>>, vector<1x64xf32>
    tpu.vector_store %arg6[%c0_14, %c0_15], %18 {strides = array<i32>} : memref<1x64xf32, #tpu.memory_space<vmem>>, vector<1x64xf32>,
    return
  }
  func.func @transform_0(%arg0: i32) -> (i32, i32) {
    %c0_i32 = arith.constant 0 : i32
    %c0_i32_0 = arith.constant 0 : i32
    return %arg0, %c0_i32 : i32, i32
  }
  func.func @transform_1(%arg0: i32) -> (i32, i32) {
    %c0_i32 = arith.constant 0 : i32
    %c0_i32_0 = arith.constant 0 : i32
    return %arg0, %c0_i32 : i32, i32
  }
  func.func @transform_2(%arg0: i32) -> (i32, i32) {
    %c0_i32 = arith.constant 0 : i32
    %c0_i32_0 = arith.constant 0 : i32
    return %arg0, %c0_i32 : i32, i32
  }
  func.func @transform_3(%arg0: i32) -> (i32, i32) {
    %c0_i32 = arith.constant 0 : i32
    %c0_i32_0 = arith.constant 0 : i32
    %c0_i32_1 = arith.constant 0 : i32
    return %c0_i32, %c0_i32_0 : i32, i32
  }
  func.func @transform_4(%arg0: i32) -> (i32, i32) {
    %c0_i32 = arith.constant 0 : i32
    %c0_i32_0 = arith.constant 0 : i32
    %c0_i32_1 = arith.constant 0 : i32
    return %c0_i32, %c0_i32_0 : i32, i32
  }
  func.func @transform_5(%arg0: i32) -> (i32, i32) {
    %c0_i32 = arith.constant 0 : i32
    %c0_i32_0 = arith.constant 0 : i32
    return %c0_i32, %arg0 : i32, i32
  }
}

</mosaic_0001>

<bundles_post_ra>
// kernel: tpu_custom_call.1
= control target key start
LH: loop header
LB: loop body
LE: loop exit
PB: predicated region body
PF: predicated region fallthrough
CT: control target
= control target key end

     0   :  { %10 = vsyncpa [#allocation3], 0  ;;  %s2498_s0 = inlined_call_operand.hbm [shape: bf16[64,256], index: 0, kind: input, shape index: {}]   ;;  %s2499_s1 = inlined_call_operand.hbm [shape: bf16[64,384], index: 1, kind: input, shape index: {}]   ;;  %s2500_s2 = inlined_call_operand.hbm [shape: bf16[64,512], index: 2, kind: input, shape index: {}]   ;;  %s2501_s3 = inlined_call_operand.hbm [shape: bf16[1152,256], index: 3, kind: input, shape index: {}]   ;;  %s2502_s4 = inlined_call_operand.vmem [shape: f32[1,256], index: 4, kind: input, shape index: {}]   ;;  %s2503_s5 = inlined_call_operand.hbm [shape: f32[1,64], index: 5, kind: output, shape index: {}]  }
   0x1   :  { %11 = vsyncpa [#allocation6], 0 }
   0x2   :  { %12 = vsyncpa [#allocation9], 0 }
   0x3   :  { %13 = vsyncpa [#allocation4], 0  ;;  %s2306_s18 = smov [#allocation5]  }
   0x4   :  { %s31_s19 = sshll.u32 %s2306_s18, 4  ;;  %s32_s19 = int_to_ptr.vmem [resolvable:$true] %s31_s19 }
   0x5   :  { %s2206_s20 = scalar_lea.vmem %s32_s19, 1536  ;;  %p2211_p1 = scmp.lt.s32.totalorder %s32_s19, %s32_s19 }
   0x6   :  { %p2207_p0 = scmp.ne.s32.totalorder %s32_s19, %s2206_s20  ;;  %p2212_p2 = scmp.lt.s32.totalorder %s2206_s20, %s2206_s20 }
   0x8   :  { %p2213_p3 = por %p2212_p2, %p2211_p1 }
   0xa   :  { %p2214_p4 = pnand %p2213_p3, %p2207_p0 }
   0xc   :  { %2217 = shalt.err (!%p2214_p4)
}
   0xd   :  { %s2307_s21 = smov 192   ;;  %s2308_s22 = smov 12  }
   0xe   :  { %37 = dma.hbm_to_vmem [thread:$0]  %s2499_s1, 1536, %s32_s19, [#allocation6], %s2307_s21, %s2307_s21, %s2308_s22  }
   0xf   :  { %s2309_s25 = smov [#allocation2]  }
  0x10   :  { %s19_s26 = sshll.u32 %s2309_s25, 4  ;;  %s20_s26 = int_to_ptr.vmem [resolvable:$true] %s19_s26 }
  0x11   :  { %s2226_s27 = scalar_lea.vmem %s20_s26, 1024  ;;  %p2231_p6 = scmp.lt.s32.totalorder %s20_s26, %s20_s26 }
  0x12   :  { %p2227_p5 = scmp.ne.s32.totalorder %s20_s26, %s2226_s27  ;;  %p2232_p7 = scmp.lt.s32.totalorder %s2226_s27, %s2226_s27 }
  0x14   :  { %p2233_p8 = por %p2232_p7, %p2231_p6 }
  0x16   :  { %p2234_p9 = pnand %p2233_p8, %p2227_p5 }
  0x18   :  { %2237 = shalt.err (!%p2234_p9)
}
  0x19   :  { %s2310_s28 = smov 128   ;;  %s2311_s29 = smov 8  }
  0x1a   :  { %25 = dma.hbm_to_vmem [thread:$0]  %s2498_s0, 1024, %s20_s26, [#allocation3], %s2310_s28, %s2310_s28, %s2311_s29  }
  0x1b   :  { %s2312_s7 = smov [#allocation7]  }
  0x1c   :  { %s43_s8 = sshll.u32 %s2312_s7, 4  ;;  %s44_s8 = int_to_ptr.vmem [resolvable:$true] %s43_s8 }
  0x1d   :  { %s2246_s1 = scalar_lea.vmem %s44_s8, 2048  ;;  %p2251_p11 = scmp.lt.s32.totalorder %s44_s8, %s44_s8 }
  0x1e   :  { %p2247_p10 = scmp.ne.s32.totalorder %s44_s8, %s2246_s1  ;;  %p2252_p12 = scmp.lt.s32.totalorder %s2246_s1, %s2246_s1 }
  0x20   :  { %p2253_p13 = por %p2252_p12, %p2251_p11 }
  0x22   :  { %p2254_p0 = pnand %p2253_p13, %p2247_p10 }
  0x24   :  { %2257 = shalt.err (!%p2254_p0)
}
  0x25   :  { %s2313_s9 = smov 256   ;;  %s2314_s10 = smov 16  }
  0x26   :  { %49 = dma.hbm_to_vmem [thread:$0]  %s2500_s2, 2048, %s44_s8, [#allocation6], %s2313_s9, %s2313_s9, %s2314_s10  }
  0x27   :  { %s2315_s13 = smov [#allocation8]  }
  0x28   :  { %s55_s14 = sshll.u32 %s2315_s13, 4  ;;  %s56_s14 = int_to_ptr.vmem [resolvable:$true] %s55_s14 }
  0x29   :  { %s2266_s0 = scalar_lea.vmem %s56_s14, 18432  ;;  %p2271_p2 = scmp.lt.s32.totalorder %s56_s14, %s56_s14 }
  0x2a   :  { %p2267_p1 = scmp.ne.s32.totalorder %s56_s14, %s2266_s0  ;;  %p2272_p3 = scmp.lt.s32.totalorder %s2266_s0, %s2266_s0 }
  0x2c   :  { %p2273_p4 = por %p2272_p3, %p2271_p2 }
  0x2e   :  { %p2274_p5 = pnand %p2273_p4, %p2267_p1 }
  0x30   :  { %2277 = shalt.err (!%p2274_p5)
}
  0x31   :  { %61 = dma.hbm_to_vmem [thread:$0]  %s2501_s3, 18432, %s56_s14, [#allocation9], %s2310_s28, %s2310_s28, %s2311_s29  }
  0x32   :  { %2298 = dma.done.wait [#allocation3], 1024  }
  0x33   :  { %2299 = vsyncadd [#allocation3], 4294966272 }
  0x34   :  { %2300 = dma.done.wait [#allocation6], 3584  }
  0x35   :  { %2301 = vsyncadd [#allocation6], 4294963712 }
  0x36   :  { %2302 = dma.done.wait [#allocation9], 18432  }
  0x37   :  { %2303 = vsyncadd [#allocation9], 4294948864  ;;  %v2316_v0 = vmov 0   ;;  %v1914_v1 = vld [vmem:[#allocation8 + $0x174] ss:$8 sps:$4 sm:$0xff]  }
  0x38   :  { %590 = vmatprep.mubr.bf16.mxu1 %v2316_v0  ;;  %v1916_v2 = vld [vmem:[#allocation8 + $0x274] ss:$8 sps:$4 sm:$0xff]   ;;  %485 = vmatprep.subr.bf16.mxu0 %v1914_v1  ;;  %v1918_v3 = vld [vmem:[#allocation8 + $0x170] ss:$8 sps:$4 sm:$0xff]   ;;  %v1920_v5 = vld [vmem:[#allocation8 + $0x164] ss:$8 sps:$4 sm:$0xff]  }
  0x39   :  { %v1919_v4 = vld [vmem:[#allocation8 + $0x270] ss:$8 sps:$4 sm:$0xff]   ;;  %558 = vmatprep.subr.bf16.mxu1 %v1916_v2  ;;  %486 = vmatpush1.bf16.msra.mxu0 %v1918_v3  ;;  %v1922_v6 = vld [vmem:[#allocation8 + $0x264] ss:$8 sps:$4 sm:$0xff]   ;;  %v1924_v7 = vld [vmem:[#allocation8 + $0x160] ss:$8 sps:$4 sm:$0xff]  }
  0x3a   :  { %559 = vmatpush1.bf16.msra.mxu1 %v1919_v4  ;;  %487 = vmatprep.subr.bf16.mxu0 %v1920_v5  ;;  %v1925_v8 = vld [vmem:[#allocation8 + $0x260] ss:$8 sps:$4 sm:$0xff]   ;;  %v1926_v9 = vld [vmem:[#allocation8 + $0x154] ss:$8 sps:$4 sm:$0xff]   ;;  %v1930_v11 = vld [vmem:[#allocation8 + $0x150] ss:$8 sps:$4 sm:$0xff]  }
  0x3b   :  { %560 = vmatprep.subr.bf16.mxu1 %v1922_v6  ;;  %v1928_v10 = vld [vmem:[#allocation8 + $0x254] ss:$8 sps:$4 sm:$0xff]   ;;  %v1931_v12 = vld [vmem:[#allocation8 + $0x250] ss:$8 sps:$4 sm:$0xff]   ;;  %v1932_v13 = vld [vmem:[#allocation8 + $0x144] ss:$8 sps:$4 sm:$0xff]  }
  0x3c   :  { %v1934_v14 = vld [vmem:[#allocation8 + $0x244] ss:$8 sps:$4 sm:$0xff]   ;;  %v1936_v15 = vld [vmem:[#allocation8 + $0x140] ss:$8 sps:$4 sm:$0xff]   ;;  %v1938_v17 = vld [vmem:[#allocation8 + $0x134] ss:$8 sps:$4 sm:$0xff]  }
  0x3d   :  { %488 = vmatpush1.bf16.msra.mxu0 %v1924_v7  ;;  %v1937_v16 = vld [vmem:[#allocation8 + $0x240] ss:$8 sps:$4 sm:$0xff]   ;;  %v1940_v18 = vld [vmem:[#allocation8 + $0x234] ss:$8 sps:$4 sm:$0xff]   ;;  %v1942_v19 = vld [vmem:[#allocation8 + $0x130] ss:$8 sps:$4 sm:$0xff]  }
  0x3e   :  { %561 = vmatpush1.bf16.msra.mxu1 %v1925_v8  ;;  %489 = vmatprep.subr.bf16.mxu0 %v1926_v9  ;;  %v1943_v20 = vld [vmem:[#allocation8 + $0x230] ss:$8 sps:$4 sm:$0xff]   ;;  %v1944_v21 = vld [vmem:[#allocation8 + $0x124] ss:$8 sps:$4 sm:$0xff]   ;;  %v1948_v23 = vld [vmem:[#allocation8 + $0x120] ss:$8 sps:$4 sm:$0xff]  }
  0x3f   :  { %562 = vmatprep.subr.bf16.mxu1 %v1928_v10  ;;  %v1946_v22 = vld [vmem:[#allocation8 + $0x224] ss:$8 sps:$4 sm:$0xff]   ;;  %v1949_v24 = vld [vmem:[#allocation8 + $0x220] ss:$8 sps:$4 sm:$0xff]   ;;  %v1950_v25 = vld [vmem:[#allocation8 + $0x114] ss:$8 sps:$4 sm:$0xff]  }
  0x40   :  { %v1952_v26 = vld [vmem:[#allocation8 + $0x214] ss:$8 sps:$4 sm:$0xff]   ;;  %v1954_v27 = vld [vmem:[#allocation8 + $0x110] ss:$8 sps:$4 sm:$0xff]   ;;  %v1956_v29 = vld [vmem:[#allocation8 + $0x104] ss:$8 sps:$4 sm:$0xff]  }
  0x41   :  { %490 = vmatpush1.bf16.msra.mxu0 %v1930_v11  ;;  %v1955_v28 = vld [vmem:[#allocation8 + $0x210] ss:$8 sps:$4 sm:$0xff]   ;;  %v1958_v30 = vld [vmem:[#allocation8 + $0x204] ss:$8 sps:$4 sm:$0xff]   ;;  %v1960_v31 = vld [vmem:[#allocation8 + $0x100] ss:$8 sps:$4 sm:$0xff]  }
  0x42   :  { %563 = vmatpush1.bf16.msra.mxu1 %v1931_v12  ;;  %491 = vmatprep.subr.bf16.mxu0 %v1932_v13  ;;  %v1961_v32 = vld [vmem:[#allocation8 + $0x200] ss:$8 sps:$4 sm:$0xff]   ;;  %v1962_v33 = vld [vmem:[#allocation8 + $0x1f4] ss:$8 sps:$4 sm:$0xff]   ;;  %v1965_v36 = vld [vmem:[#allocation8 + $0x70] ss:$8 sps:$4 sm:$0xff]  }
  0x43   :  { %564 = vmatprep.subr.bf16.mxu1 %v1934_v14  ;;  %v1967_v34 = vld [vmem:[#allocation8 + $0x74] ss:$8 sps:$4 sm:$0xff]   ;;  %v1968_v37 = vld [vmem:[#allocation8 + $0x1f0] ss:$8 sps:$4 sm:$0xff]   ;;  %v1969_v38 = vld [vmem:[#allocation8 + $0x1e4] ss:$8 sps:$4 sm:$0xff]  }
  0x44   :  { %v1964_v35 = vld [vmem:[#allocation5 + $0x8] ss:$12 sps:$4 sm:$0xff]   ;;  %v1973_v39 = vld [vmem:[#allocation8 + $0x64] ss:$8 sps:$4 sm:$0xff]   ;;  %v1977_v44 = vld [vmem:[#allocation8 + $0x50] ss:$8 sps:$4 sm:$0xff]  }
  0x45   :  { %492 = vmatpush1.bf16.msra.mxu0 %v1936_v15  ;;  %v1971_v40 = vld [vmem:[#allocation8 + $0x60] ss:$8 sps:$4 sm:$0xff]   ;;  %v1975_v42 = vld [vmem:[#allocation8 + $0x1d4] ss:$8 sps:$4 sm:$0xff]   ;;  %v1980_v45 = vld [vmem:[#allocation8 + $0x1d0] ss:$8 sps:$4 sm:$0xff]  }
  0x46   :  { %565 = vmatpush1.bf16.msra.mxu1 %v1937_v16  ;;  %493 = vmatprep.subr.bf16.mxu0 %v1938_v17  ;;  %v1974_v41 = vld [vmem:[#allocation8 + $0x1e0] ss:$8 sps:$4 sm:$0xff]   ;;  %v1979_v43 = vld [vmem:[#allocation8 + $0x54] ss:$8 sps:$4 sm:$0xff]   ;;  %v1981_v46 = vld [vmem:[#allocation8 + $0x1c4] ss:$8 sps:$4 sm:$0xff]  }
  0x47   :  { %566 = vmatprep.subr.bf16.mxu1 %v1940_v18  ;;  %v1985_v47 = vld [vmem:[#allocation8 + $0x44] ss:$8 sps:$4 sm:$0xff]   ;;  %v1983_v48 = vld [vmem:[#allocation8 + $0x40] ss:$8 sps:$4 sm:$0xff]   ;;  %v1987_v50 = vld [vmem:[#allocation8 + $0x1b4] ss:$8 sps:$4 sm:$0xff]  }
  0x48   :  { %v1986_v49 = vld [vmem:[#allocation8 + $0x1c0] ss:$8 sps:$4 sm:$0xff]   ;;  %v2013_v51 = vld [vmem:[#allocation5 + $0x4] ss:$12 sps:$4 sm:$0xff]   ;;  %v1991_v52 = vld [vmem:[#allocation8 + $0x34] ss:$8 sps:$4 sm:$0xff]  }
  0x49   :  { %494 = vmatpush1.bf16.msra.mxu0 %v1942_v19  ;;  %517 = vmatprep.mubr.bf16.mxu0 %v2013_v51  ;;  %v2017_v53 = vld [vmem:[#allocation5 + $0x20] ss:$12 sps:$4 sm:$0xff]   ;;  %v1989_v54 = vld [vmem:[#allocation8 + $0x30] ss:$8 sps:$4 sm:$0xff]   ;;  %v1999_v60 = vld [vmem:[#allocation8 + $0x194] ss:$8 sps:$4 sm:$0xff]  }
  0x4a   :  { %567 = vmatpush1.bf16.msra.mxu1 %v1943_v20  ;;  %495 = vmatprep.subr.bf16.mxu0 %v1944_v21  ;;  %v1992_v55 = vld [vmem:[#allocation8 + $0x1b0] ss:$8 sps:$4 sm:$0xff]   ;;  %v1993_v56 = vld [vmem:[#allocation8 + $0x1a4] ss:$8 sps:$4 sm:$0xff]   ;;  %v1995_v58 = vld [vmem:[#allocation8 + $0x20] ss:$8 sps:$4 sm:$0xff]  }
  0x4b   :  { %568 = vmatprep.subr.bf16.mxu1 %v1946_v22  ;;  %v1997_v57 = vld [vmem:[#allocation8 + $0x24] ss:$8 sps:$4 sm:$0xff]   ;;  %v1998_v59 = vld [vmem:[#allocation8 + $0x1a0] ss:$8 sps:$4 sm:$0xff]   ;;  %v2003_v61 = vld [vmem:[#allocation8 + $0x14] ss:$8 sps:$4 sm:$0xff]  }
  0x4c   :  { %v2001_v62 = vld [vmem:[#allocation8 + $0x10] ss:$8 sps:$4 sm:$0xff]   ;;  %v2005_v2 = vld [vmem:[#allocation8 + $0x184] ss:$8 sps:$4 sm:$0xff]   ;;  %v2007_v4 = vld [vmem:[#allocation8] ss:$8 sps:$4 sm:$0xff]  }
  0x4d   :  { %496 = vmatpush1.bf16.msra.mxu0 %v1948_v23  ;;  %v2027_v63 = vld [vmem:[#allocation5 + $0x38] ss:$12 sps:$4 sm:$0xff]   ;;  %v2010_v5 = vld [vmem:[#allocation8 + $0x180] ss:$8 sps:$4 sm:$0xff]   ;;  %v2016_v7 = vld [vmem:[#allocation8 + $0xf4] ss:$8 sps:$4 sm:$0xff]  }
  0x4e   :  { %569 = vmatpush1.bf16.msra.mxu1 %v1949_v24  ;;  %497 = vmatprep.subr.bf16.mxu0 %v1950_v25  ;;  %v2004_v1 = vld [vmem:[#allocation8 + $0x190] ss:$8 sps:$4 sm:$0xff]   ;;  %v2009_v3 = vld [vmem:[#allocation8 + $0x4] ss:$8 sps:$4 sm:$0xff]   ;;  %v2049_v9 = vld [vmem:[#allocation8 + $0x2f4] ss:$8 sps:$4 sm:$0xff]  }
  0x4f   :  { %570 = vmatprep.subr.bf16.mxu1 %v1952_v26  ;;  %v2011_v6 = vld [vmem:[#allocation5] ss:$12 sps:$4 sm:$0xff]   ;;  %v2037_v8 = vld [vmem:[#allocation5 + $0x50] ss:$12 sps:$4 sm:$0xff]   ;;  %v2023_v18 = vld [vmem:[#allocation5 + $0x18] ss:$12 sps:$4 sm:$0xff]  }
  0x50   :  { %v2014_v10 = vld [vmem:[#allocation8 + $0xf0] ss:$8 sps:$4 sm:$0xff]   ;;  %v2020_v11 = vld [vmem:[#allocation8 + $0xe4] ss:$8 sps:$4 sm:$0xff]   ;;  %v2021_v12 = vld [vmem:[#allocation5 + $0x1c] ss:$12 sps:$4 sm:$0xff]  }
  0x51   :  { %498 = vmatpush1.bf16.msra.mxu0 %v1954_v27  ;;  %v2047_v13 = vld [vmem:[#allocation8 + $0x2f0] ss:$8 sps:$4 sm:$0xff]   ;;  %v2055_v14 = vld [vmem:[#allocation8 + $0x2e4] ss:$8 sps:$4 sm:$0xff]   ;;  %v2018_v15 = vld [vmem:[#allocation8 + $0xe0] ss:$8 sps:$4 sm:$0xff]  }
  0x52   :  { %571 = vmatpush1.bf16.msra.mxu1 %v1955_v28  ;;  %499 = vmatprep.subr.bf16.mxu0 %v1956_v29  ;;  %v2026_v16 = vld [vmem:[#allocation8 + $0xd4] ss:$8 sps:$4 sm:$0xff]   ;;  %v2053_v17 = vld [vmem:[#allocation8 + $0x2e0] ss:$8 sps:$4 sm:$0xff]   ;;  %v2024_v20 = vld [vmem:[#allocation8 + $0xd0] ss:$8 sps:$4 sm:$0xff]  }
  0x53   :  { %572 = vmatprep.subr.bf16.mxu1 %v1958_v30  ;;  %v2064_v19 = vld [vmem:[#allocation8 + $0x2d4] ss:$8 sps:$4 sm:$0xff]   ;;  %v2030_v21 = vld [vmem:[#allocation8 + $0xc4] ss:$8 sps:$4 sm:$0xff]   ;;  %v2062_v23 = vld [vmem:[#allocation8 + $0x2d0] ss:$8 sps:$4 sm:$0xff]  }
  0x54   :  { %v2031_v22 = vld [vmem:[#allocation5 + $0x34] ss:$12 sps:$4 sm:$0xff]   ;;  %v2070_v24 = vld [vmem:[#allocation8 + $0x2c4] ss:$8 sps:$4 sm:$0xff]   ;;  %v2033_v28 = vld [vmem:[#allocation5 + $0x30] ss:$12 sps:$4 sm:$0xff]  }
  0x55   :  { %500 = vmatpush1.bf16.msra.mxu0 %v1960_v31  ;;  %v2028_v25 = vld [vmem:[#allocation8 + $0xc0] ss:$8 sps:$4 sm:$0xff]   ;;  %v2036_v26 = vld [vmem:[#allocation8 + $0xb4] ss:$8 sps:$4 sm:$0xff]   ;;  %v2034_v30 = vld [vmem:[#allocation8 + $0xb0] ss:$8 sps:$4 sm:$0xff]  }
  0x56   :  { %573 = vmatpush1.bf16.msra.mxu1 %v1961_v32  ;;  %501 = vmatprep.subr.bf16.mxu0 %v1962_v33  ;;  %v2068_v27 = vld [vmem:[#allocation8 + $0x2c0] ss:$8 sps:$4 sm:$0xff]   ;;  %v2079_v29 = vld [vmem:[#allocation8 + $0x2b4] ss:$8 sps:$4 sm:$0xff]   ;;  %v2040_v31 = vld [vmem:[#allocation8 + $0xa4] ss:$8 sps:$4 sm:$0xff]  }
  0x57   :  { %831 = vmatprep.subr.bf16.mxu1 %v1967_v34  ;;  %v2041_v32 = vld [vmem:[#allocation5 + $0x4c] ss:$12 sps:$4 sm:$0xff]   ;;  %v2071_v51 = vld [vmem:[#allocation2 + $0x14] ss:$8 sps:$4 sm:$0xff]  }
  0x58   :  { %v2077_v33 = vld [vmem:[#allocation8 + $0x2b0] ss:$8 sps:$4 sm:$0xff]   ;;  %v2085_v34 = vld [vmem:[#allocation8 + $0x2a4] ss:$8 sps:$4 sm:$0xff]  }
  0x59   :  { %591 = vmatmul.mubr.bf16.vlgmr.msra.gmra.mxu1 %v1964_v35  ;;  %502 = vmatpush2.bf16.msra.mxu0 %v1968_v37  ;;  %v2038_v35 = vld [vmem:[#allocation8 + $0xa0] ss:$8 sps:$4 sm:$0xff]  }
  0x5a   :  { %832 = vmatpush1.bf16.msra.mxu1 %v1965_v36  ;;  %503 = vmatprep.subr.bf16.mxu0 %v1969_v38  ;;  %v2046_v36 = vld [vmem:[#allocation8 + $0x94] ss:$8 sps:$4 sm:$0xff]   ;;  %v2083_v37 = vld [vmem:[#allocation8 + $0x2a0] ss:$8 sps:$4 sm:$0xff]  }
  0x5b   :  { %833 = vmatprep.subr.bf16.mxu1 %v1973_v39  ;;  %600 = vmatprep.mubr.bf16.mxu1 %v2316_v0  ;;  %v2094_v38 = vld [vmem:[#allocation8 + $0x294] ss:$8 sps:$4 sm:$0xff]  }
  0x5c   :  { %v2043_v39 = vld [vmem:[#allocation5 + $0x48] ss:$12 sps:$4 sm:$0xff]  }
  0x5d   :  { %504 = vmatpush2.bf16.msra.mxu0 %v1974_v41  ;;  %v2052_v41 = vld [vmem:[#allocation8 + $0x84] ss:$8 sps:$4 sm:$0xff]  }
  0x5e   :  { %834 = vmatpush1.bf16.msra.mxu1 %v1971_v40  ;;  %505 = vmatprep.subr.bf16.mxu0 %v1975_v42  ;;  %v2044_v40 = vld [vmem:[#allocation8 + $0x90] ss:$8 sps:$4 sm:$0xff]  }
  0x5f   :  { %835 = vmatprep.subr.bf16.mxu1 %v1979_v43  ;;  %v2092_v42 = vld [vmem:[#allocation8 + $0x290] ss:$8 sps:$4 sm:$0xff]   ;;  %v2100_v43 = vld [vmem:[#allocation8 + $0x284] ss:$8 sps:$4 sm:$0xff]  }
  0x61   :  { %506 = vmatpush2.bf16.msra.mxu0 %v1980_v45  ;;  %601 = vmatmul.mubr.bf16.gmra.mxu1 %v2017_v53  ;;  %v2061_v45 = vld [vmem:[#allocation8 + $0x3f4] ss:$8 sps:$4 sm:$0xff]   ;;  %v2115_v53 = vld [vmem:[#allocation8 + $0x364] ss:$8 sps:$4 sm:$0xff]  }
  0x62   :  { %836 = vmatpush1.bf16.msra.mxu1 %v1977_v44  ;;  %507 = vmatprep.subr.bf16.mxu0 %v1981_v46  ;;  %v2050_v44 = vld [vmem:[#allocation8 + $0x80] ss:$8 sps:$4 sm:$0xff]  }
  0x63   :  { %837 = vmatprep.subr.bf16.mxu1 %v1985_v47  ;;  %610 = vmatprep.mubr.bf16.mxu1 %v2316_v0  ;;  %v2098_v46 = vld [vmem:[#allocation8 + $0x280] ss:$8 sps:$4 sm:$0xff]  }
  0x64   :  { %v2056_v47 = vld [vmem:[#allocation2] ss:$8 sps:$4 sm:$0xff]  }
  0x65   :  { %508 = vmatpush2.bf16.msra.mxu0 %v1986_v49  ;;  %v2059_v49 = vld [vmem:[#allocation8 + $0x3f0] ss:$8 sps:$4 sm:$0xff]  }
  0x66   :  { %838 = vmatpush1.bf16.msra.mxu1 %v1983_v48  ;;  %509 = vmatprep.subr.bf16.mxu0 %v1987_v50  ;;  %v2109_v48 = vld [vmem:[#allocation8 + $0x374] ss:$8 sps:$4 sm:$0xff]   ;;  %v2067_v50 = vld [vmem:[#allocation8 + $0x3e4] ss:$8 sps:$4 sm:$0xff]  }
  0x67   :  { %839 = vmatprep.subr.bf16.mxu1 %v1991_v52  ;;  %v2107_v52 = vld [vmem:[#allocation8 + $0x370] ss:$8 sps:$4 sm:$0xff]  }
  0x69   :  { %510 = vmatpush2.bf16.msra.mxu0 %v1992_v55  ;;  %611 = vmatmul.mubr.bf16.gmra.mxu1 %v2027_v63  ;;  %v2076_v55 = vld [vmem:[#allocation8 + $0x3d4] ss:$8 sps:$4 sm:$0xff]   ;;  %v2127_v63 = vld [vmem:[#allocation8 + $0x344] ss:$8 sps:$4 sm:$0xff]  }
  0x6a   :  { %840 = vmatpush1.bf16.msra.mxu1 %v1989_v54  ;;  %511 = vmatprep.subr.bf16.mxu0 %v1993_v56  ;;  %v2065_v54 = vld [vmem:[#allocation8 + $0x3e0] ss:$8 sps:$4 sm:$0xff]  }
  0x6b   :  { %841 = vmatprep.subr.bf16.mxu1 %v1997_v57  ;;  %620 = vmatprep.mubr.bf16.mxu1 %v2316_v0  ;;  %v2058_v0 = vld [vmem:[#allocation2 + $0x4] ss:$8 sps:$4 sm:$0xff]   ;;  %v2113_v56 = vld [vmem:[#allocation8 + $0x360] ss:$8 sps:$4 sm:$0xff]   ;;  %v2073_v57 = vld [vmem:[#allocation2 + $0x10] ss:$8 sps:$4 sm:$0xff]  }
  0x6d   :  { %512 = vmatpush2.bf16.msra.mxu0 %v1998_v59  ;;  %v2074_v59 = vld [vmem:[#allocation8 + $0x3d0] ss:$8 sps:$4 sm:$0xff]  }
  0x6e   :  { %842 = vmatpush1.bf16.msra.mxu1 %v1995_v58  ;;  %513 = vmatprep.subr.bf16.mxu0 %v1999_v60  ;;  %v2121_v58 = vld [vmem:[#allocation8 + $0x354] ss:$8 sps:$4 sm:$0xff]   ;;  %v2082_v60 = vld [vmem:[#allocation8 + $0x3c4] ss:$8 sps:$4 sm:$0xff]  }
  0x6f   :  { %843 = vmatprep.subr.bf16.mxu1 %v2003_v61  ;;  %v2086_v61 = vld [vmem:[#allocation2 + $0x24] ss:$8 sps:$4 sm:$0xff]  }
  0x71   :  { %514 = vmatpush2.bf16.msra.mxu0 %v2004_v1  ;;  %621 = vmatmul.mubr.bf16.gmra.mxu1 %v2037_v8  ;;  %v2080_v1 = vld [vmem:[#allocation8 + $0x3c0] ss:$8 sps:$4 sm:$0xff]   ;;  %v2097_v8 = vld [vmem:[#allocation8 + $0x3a4] ss:$8 sps:$4 sm:$0xff]  }
  0x72   :  { %844 = vmatpush1.bf16.msra.mxu1 %v2001_v62  ;;  %515 = vmatprep.subr.bf16.mxu0 %v2005_v2  ;;  %v2119_v62 = vld [vmem:[#allocation8 + $0x350] ss:$8 sps:$4 sm:$0xff]   ;;  %v2091_v2 = vld [vmem:[#allocation8 + $0x3b4] ss:$8 sps:$4 sm:$0xff]  }
  0x73   :  { %845 = vmatprep.subr.bf16.mxu1 %v2009_v3  ;;  %863 = vmatprep.mubr.bf16.mxu1 %v2058_v0  ;;  %v2088_v3 = vld [vmem:[#allocation2 + $0x20] ss:$8 sps:$4 sm:$0xff]   ;;  %v2145_v0 = vld [vmem:[#allocation8 + $0x314] ss:$8 sps:$4 sm:$0xff]  }
  0x75   :  { %516 = vmatpush2.bf16.msra.mxu0 %v2010_v5  ;;  %v2133_v5 = vld [vmem:[#allocation8 + $0x334] ss:$8 sps:$4 sm:$0xff]  }
  0x76   :  { %846 = vmatpush1.bf16.msra.mxu1 %v2007_v4  ;;  %1384 = vmatprep.subr.bf16.mxu0 %v2049_v9  ;;  %v2125_v4 = vld [vmem:[#allocation8 + $0x340] ss:$8 sps:$4 sm:$0xff]   ;;  %v2101_v9 = vld [vmem:[#allocation2 + $0x34] ss:$8 sps:$4 sm:$0xff]  }
  0x77   :  { %847 = vmatprep.subr.bf16.mxu1 %v2016_v7  ;;  %v2089_v7 = vld [vmem:[#allocation8 + $0x3b0] ss:$8 sps:$4 sm:$0xff]  }
  0x78   :  { %518 = vmatmul.mubr.bf16.vlgmr.msra.gmra.mxu0 %v2011_v6  ;;  %v2157_v6 = vld [vmem:[#allocation7 + $0x4] ss:$16 sps:$4 sm:$0xff]  }
  0x79   :  { %527 = vmatprep.mubr.bf16.mxu0 %v2021_v12  ;;  %1385 = vmatpush1.bf16.msra.mxu0 %v2047_v13  ;;  %v2095_v12 = vld [vmem:[#allocation8 + $0x3a0] ss:$8 sps:$4 sm:$0xff]   ;;  %v2106_v13 = vld [vmem:[#allocation8 + $0x394] ss:$8 sps:$4 sm:$0xff]  }
  0x7a   :  { %848 = vmatpush2.bf16.msra.mxu1 %v2014_v10  ;;  %1386 = vmatprep.subr.bf16.mxu0 %v2055_v14  ;;  %v2131_v10 = vld [vmem:[#allocation8 + $0x330] ss:$8 sps:$4 sm:$0xff]   ;;  %v2137_v14 = vld [vmem:[#allocation8 + $0x320] ss:$8 sps:$4 sm:$0xff]  }
  0x7b   :  { %849 = vmatprep.subr.bf16.mxu1 %v2020_v11  ;;  %v2139_v11 = vld [vmem:[#allocation8 + $0x324] ss:$8 sps:$4 sm:$0xff]  }
  0x7d   :  { %1387 = vmatpush1.bf16.msra.mxu0 %v2053_v17  ;;  %v2163_v17 = vld [vmem:[#allocation7 + $0xc] ss:$16 sps:$4 sm:$0xff]  }
  0x7e   :  { %850 = vmatpush2.bf16.msra.mxu1 %v2018_v15  ;;  %1388 = vmatprep.subr.bf16.mxu0 %v2064_v19  ;;  %v2103_v15 = vld [vmem:[#allocation2 + $0x30] ss:$8 sps:$4 sm:$0xff]  }
  0x7f   :  { %851 = vmatprep.subr.bf16.mxu1 %v2026_v16  ;;  %v2104_v16 = vld [vmem:[#allocation8 + $0x390] ss:$8 sps:$4 sm:$0xff]  }
  0x80   :  { %528 = vmatmul.mubr.bf16.gmra.mxu0 %v2023_v18  ;;  %v2112_v18 = vld [vmem:[#allocation8 + $0x384] ss:$8 sps:$4 sm:$0xff]   ;;  %v2143_v19 = vld [vmem:[#allocation8 + $0x310] ss:$8 sps:$4 sm:$0xff]  }
  0x81   :  { %537 = vmatprep.mubr.bf16.mxu0 %v2031_v22  ;;  %1389 = vmatpush1.bf16.msra.mxu0 %v2062_v23  ;;  %v2118_v22 = vld [vmem:[#allocation8 + $0x474] ss:$8 sps:$4 sm:$0xff]   ;;  %v2149_v23 = vld [vmem:[#allocation8 + $0x300] ss:$8 sps:$4 sm:$0xff]  }
  0x82   :  { %852 = vmatpush2.bf16.msra.mxu1 %v2024_v20  ;;  %1390 = vmatprep.subr.bf16.mxu0 %v2070_v24  ;;  %v2151_v20 = vld [vmem:[#allocation8 + $0x304] ss:$8 sps:$4 sm:$0xff]   ;;  %v2116_v24 = vld [vmem:[#allocation8 + $0x470] ss:$8 sps:$4 sm:$0xff]  }
  0x83   :  { %853 = vmatprep.subr.bf16.mxu1 %v2030_v21  ;;  %v2110_v21 = vld [vmem:[#allocation8 + $0x380] ss:$8 sps:$4 sm:$0xff]  }
  0x85   :  { %1391 = vmatpush1.bf16.msra.mxu0 %v2068_v27  ;;  %v2164_v27 = vld [vmem:[#allocation7 + $0x24] ss:$16 sps:$4 sm:$0xff]  }
  0x86   :  { %854 = vmatpush2.bf16.msra.mxu1 %v2028_v25  ;;  %1392 = vmatprep.subr.bf16.mxu0 %v2079_v29  ;;  %v2155_v25 = vld [vmem:[#allocation7] ss:$16 sps:$4 sm:$0xff]   ;;  %v2130_v29 = vld [vmem:[#allocation8 + $0x454] ss:$8 sps:$4 sm:$0xff]  }
  0x87   :  { %855 = vmatprep.subr.bf16.mxu1 %v2036_v26  ;;  %v2124_v26 = vld [vmem:[#allocation8 + $0x464] ss:$8 sps:$4 sm:$0xff]  }
  0x88   :  { %538 = vmatmul.mubr.bf16.gmra.mxu0 %v2033_v28  ;;  %v2122_v28 = vld [vmem:[#allocation8 + $0x460] ss:$8 sps:$4 sm:$0xff]  }
  0x89   :  { %547 = vmatprep.mubr.bf16.mxu0 %v2041_v32  ;;  %1393 = vmatpush1.bf16.msra.mxu0 %v2077_v33  ;;  %v2136_v32 = vld [vmem:[#allocation8 + $0x444] ss:$8 sps:$4 sm:$0xff]  }
  0x8a   :  { %856 = vmatpush2.bf16.msra.mxu1 %v2034_v30  ;;  %1394 = vmatprep.subr.bf16.mxu0 %v2085_v34  ;;  %v2128_v30 = vld [vmem:[#allocation8 + $0x450] ss:$8 sps:$4 sm:$0xff]   ;;  %v2170_v33 = vld [vmem:[#allocation7 + $0x44] ss:$16 sps:$4 sm:$0xff]   ;;  %v2134_v34 = vld [vmem:[#allocation8 + $0x440] ss:$8 sps:$4 sm:$0xff]  }
  0x8b   :  { %857 = vmatprep.subr.bf16.mxu1 %v2040_v31  ;;  %v2166_v31 = vld [vmem:[#allocation7 + $0x20] ss:$16 sps:$4 sm:$0xff]  }
  0x8d   :  { %1395 = vmatpush1.bf16.msra.mxu0 %v2083_v37  ;;  %v2172_v37 = vld [vmem:[#allocation7 + $0x40] ss:$16 sps:$4 sm:$0xff]  }
  0x8e   :  { %858 = vmatpush2.bf16.msra.mxu1 %v2038_v35  ;;  %1396 = vmatprep.subr.bf16.mxu0 %v2094_v38  ;;  %v2142_v35 = vld [vmem:[#allocation8 + $0x434] ss:$8 sps:$4 sm:$0xff]   ;;  %v2148_v38 = vld [vmem:[#allocation8 + $0x424] ss:$8 sps:$4 sm:$0xff]  }
  0x8f   :  { %859 = vmatprep.subr.bf16.mxu1 %v2046_v36  ;;  %v2140_v36 = vld [vmem:[#allocation8 + $0x430] ss:$8 sps:$4 sm:$0xff]  }
  0x90   :  { %548 = vmatmul.mubr.bf16.gmra.mxu0 %v2043_v39  ;;  %v2176_v39 = vld [vmem:[#allocation7 + $0x64] ss:$16 sps:$4 sm:$0xff]  }
  0x91   :  { %1397 = vmatpush1.bf16.msra.mxu0 %v2092_v42  ;;  %1416 = vmatprep.mubr.bf16.mxu0 %v2157_v6  ;;  %v2152_v42 = vld [vmem:[#allocation8 + $0x410] ss:$8 sps:$4 sm:$0xff]  }
  0x92   :  { %860 = vmatpush2.bf16.msra.mxu1 %v2044_v40  ;;  %1398 = vmatprep.subr.bf16.mxu0 %v2100_v43  ;;  %v2146_v40 = vld [vmem:[#allocation8 + $0x420] ss:$8 sps:$4 sm:$0xff]  }
  0x93   :  { %861 = vmatprep.subr.bf16.mxu1 %v2052_v41  ;;  %v2154_v41 = vld [vmem:[#allocation8 + $0x414] ss:$8 sps:$4 sm:$0xff]   ;;  %v2178_v43 = vld [vmem:[#allocation7 + $0x60] ss:$16 sps:$4 sm:$0xff]  }
  0x95   :  { %1399 = vmatpush1.bf16.msra.mxu0 %v2098_v46  ;;  %v2161_v46 = vld [vmem:[#allocation7 + $0x8] ss:$16 sps:$4 sm:$0xff]  }
  0x96   :  { %862 = vmatpush2.bf16.msra.mxu1 %v2050_v44  ;;  %1400 = vmatprep.subr.bf16.mxu0 %v2109_v48  ;;  %v2160_v44 = vld [vmem:[#allocation8 + $0x404] ss:$8 sps:$4 sm:$0xff]   ;;  %v2169_v48 = vld [vmem:[#allocation7 + $0x28] ss:$16 sps:$4 sm:$0xff]  }
  0x97   :  { %1457 = vmatprep.subr.bf16.mxu1 %v2061_v45  ;;  %v2158_v45 = vld [vmem:[#allocation8 + $0x400] ss:$8 sps:$4 sm:$0xff]  }
  0x99   :  { %864 = vmatmul.mubr.bf16.vlgmr.msra.gmra.mxu1 %v2056_v47  ;;  %1401 = vmatpush2.bf16.msra.mxu0 %v2107_v52  ;;  %v2167_v47 = vld [vmem:[#allocation7 + $0x2c] ss:$16 sps:$4 sm:$0xff]   ;;  %v2181_v52 = vld [vmem:[#allocation7 + $0x68] ss:$16 sps:$4 sm:$0xff]  }
  0x9a   :  { %1458 = vmatpush1.bf16.msra.mxu1 %v2059_v49  ;;  %873 = vmatprep.mubr.bf16.mxu1 %v2071_v51  ;;  %v2173_v49 = vld [vmem:[#allocation7 + $0x4c] ss:$16 sps:$4 sm:$0xff]  }
  0x9b   :  { %1459 = vmatprep.subr.bf16.mxu1 %v2067_v50  ;;  %1402 = vmatprep.subr.bf16.mxu0 %v2115_v53  ;;  %v2175_v50 = vld [vmem:[#allocation7 + $0x48] ss:$16 sps:$4 sm:$0xff]   ;;  %v2179_v51 = vld [vmem:[#allocation7 + $0x6c] ss:$16 sps:$4 sm:$0xff]  }
  0x9d   :  { %1403 = vmatpush2.bf16.msra.mxu0 %v2113_v56 }
  0x9e   :  { %1460 = vmatpush1.bf16.msra.mxu1 %v2065_v54  ;;  %1404 = vmatprep.subr.bf16.mxu0 %v2121_v58 }
  0x9f   :  { %1461 = vmatprep.subr.bf16.mxu1 %v2076_v55 }
  0xa1   :  { %874 = vmatmul.mubr.bf16.gmra.mxu1 %v2073_v57  ;;  %1405 = vmatpush2.bf16.msra.mxu0 %v2119_v62 }
  0xa2   :  { %1462 = vmatpush1.bf16.msra.mxu1 %v2074_v59  ;;  %883 = vmatprep.mubr.bf16.mxu1 %v2086_v61 }
  0xa3   :  { %1463 = vmatprep.subr.bf16.mxu1 %v2082_v60  ;;  %1406 = vmatprep.subr.bf16.mxu0 %v2127_v63 }
  0xa5   :  { %1407 = vmatpush2.bf16.msra.mxu0 %v2125_v4 }
  0xa6   :  { %1464 = vmatpush1.bf16.msra.mxu1 %v2080_v1  ;;  %1408 = vmatprep.subr.bf16.mxu0 %v2133_v5 }
  0xa7   :  { %1465 = vmatprep.subr.bf16.mxu1 %v2091_v2 }
  0xa9   :  { %884 = vmatmul.mubr.bf16.gmra.mxu1 %v2088_v3  ;;  %1409 = vmatpush2.bf16.msra.mxu0 %v2131_v10 }
  0xaa   :  { %1466 = vmatpush1.bf16.msra.mxu1 %v2089_v7  ;;  %893 = vmatprep.mubr.bf16.mxu1 %v2101_v9 }
  0xab   :  { %1467 = vmatprep.subr.bf16.mxu1 %v2097_v8  ;;  %1410 = vmatprep.subr.bf16.mxu0 %v2139_v11 }
  0xad   :  { %1411 = vmatpush2.bf16.msra.mxu0 %v2137_v14 }
  0xae   :  { %1468 = vmatpush1.bf16.msra.mxu1 %v2095_v12  ;;  %1412 = vmatprep.subr.bf16.mxu0 %v2145_v0 }
  0xaf   :  { %1469 = vmatprep.subr.bf16.mxu1 %v2106_v13 }
  0xb1   :  { %894 = vmatmul.mubr.bf16.gmra.mxu1 %v2103_v15  ;;  %1413 = vmatpush2.bf16.msra.mxu0 %v2143_v19 }
  0xb2   :  { %1470 = vmatpush1.bf16.msra.mxu1 %v2104_v16  ;;  %1489 = vmatprep.mubr.bf16.mxu1 %v2163_v17 }
  0xb3   :  { %1471 = vmatprep.subr.bf16.mxu1 %v2112_v18  ;;  %1414 = vmatprep.subr.bf16.mxu0 %v2151_v20 }
  0xb5   :  { %1415 = vmatpush2.bf16.msra.mxu0 %v2149_v23 }
  0xb6   :  { %1472 = vmatpush1.bf16.msra.mxu1 %v2110_v21 }
  0xb7   :  { %1473 = vmatprep.subr.bf16.mxu1 %v2118_v22 }
  0xb8   :  { %1417 = vmatmul.mubr.bf16.vlgmr.msra.gmra.mxu0 %v2155_v25 }
  0xb9   :  { %1426 = vmatprep.mubr.bf16.mxu0 %v2164_v27 }
  0xba   :  { %1474 = vmatpush2.bf16.msra.mxu1 %v2116_v24 }
  0xbb   :  { %1475 = vmatprep.subr.bf16.mxu1 %v2124_v26 }
  0xbe   :  { %1476 = vmatpush2.bf16.msra.mxu1 %v2122_v28 }
  0xbf   :  { %1477 = vmatprep.subr.bf16.mxu1 %v2130_v29 }
  0xc0   :  { %1427 = vmatmul.mubr.bf16.gmra.mxu0 %v2166_v31 }
  0xc1   :  { %1436 = vmatprep.mubr.bf16.mxu0 %v2170_v33 }
  0xc2   :  { %1478 = vmatpush2.bf16.msra.mxu1 %v2128_v30 }
  0xc3   :  { %1479 = vmatprep.subr.bf16.mxu1 %v2136_v32 }
  0xc6   :  { %1480 = vmatpush2.bf16.msra.mxu1 %v2134_v34 }
  0xc7   :  { %1481 = vmatprep.subr.bf16.mxu1 %v2142_v35 }
  0xc8   :  { %1437 = vmatmul.mubr.bf16.gmra.mxu0 %v2172_v37 }
  0xc9   :  { %1446 = vmatprep.mubr.bf16.mxu0 %v2176_v39  ;;  %v1548_v39 = vlaneseq }
  0xca   :  { %1482 = vmatpush2.bf16.msra.mxu1 %v2140_v36 }
  0xcb   :  { %1483 = vmatprep.subr.bf16.mxu1 %v2148_v38 }
  0xce   :  { %1484 = vmatpush2.bf16.msra.mxu1 %v2146_v40 }
  0xcf   :  { %1485 = vmatprep.subr.bf16.mxu1 %v2154_v41 }
  0xd0   :  { %1447 = vmatmul.mubr.bf16.gmra.mxu0 %v2178_v43 }
  0xd2   :  { %1486 = vmatpush2.bf16.msra.mxu1 %v2152_v42  ;;  %v1549_v42 = vshrl.u32 %v1548_v39, 7 }
  0xd3   :  { %1487 = vmatprep.subr.bf16.mxu1 %v2160_v44 }
  0xd6   :  { %1488 = vmatpush2.bf16.msra.mxu1 %v2158_v45  ;;  %v1550_v45 = vsub.s32 0, %v1549_v42 }
  0xd9   :  { %1490 = vmatmul.mubr.bf16.vlgmr.msra.gmra.mxu1 %v2161_v46 }
  0xda   :  { %1499 = vmatprep.mubr.bf16.mxu1 %v2167_v47 }
  0xe1   :  { %1500 = vmatmul.mubr.bf16.gmra.mxu1 %v2169_v48  ;;  %v1546_v48 = vld [vmem:[%s2502_s4] sm:$0x3]  ;;  %s2317_s4 = smov [#allocation10]  }
  0xe2   :  { %1509 = vmatprep.mubr.bf16.mxu1 %v2173_v49  ;;  %v1554_v49 = vsub.s32 1, %v1549_v42  ;;  %s1710_s17 = sshll.u32 %s2317_s4, 4  ;;  %s1711_s17 = int_to_ptr.vmem [resolvable:$true] %s1710_s17 }
  0xe3   :  { %s2278_s18 = scalar_lea.vmem %s1711_s17, 16  ;;  %s2282_s19 = scalar_lea.vmem %s1711_s17, 32 }
  0xe4   :  { %p2279_p6 = scmp.ne.s32.totalorder %s1711_s17, %s2278_s18  ;;  %p2283_p7 = scmp.lt.s32.totalorder %s1711_s17, %s1711_s17 }
  0xe5   :  { %p2284_p8 = scmp.lt.s32.totalorder %s2282_s19, %s2278_s18 }
  0xe7   :  { %p2285_p9 = por %p2284_p8, %p2283_p7 }
  0xe9   :  { %1510 = vmatmul.mubr.bf16.gmra.mxu1 %v2175_v50  ;;  %p2286_p10 = pnand %p2285_p9, %p2279_p6 }
  0xea   :  { %1519 = vmatprep.mubr.bf16.mxu1 %v2179_v51 }
  0xf1   :  { %1520 = vmatmul.mubr.bf16.gmra.mxu1 %v2181_v52 }
 0x119   :  { %v592_v53 = vpop.f32.mrf.mxu1 }
 0x11b   :  { %v594_v54 = vpop.f32.mrf.mxu1 }
 0x11d   :  { %v2364_v55 = vpop.f32.mrf.mxu1 }
 0x11f   :  { %v2366_v56 = vpop.f32.mrf.mxu1 }
 0x121   :  { %v2368_v57 = vpop.f32.mrf.mxu1 }
 0x123   :  { %v2370_v58 = vpop.f32.mrf.mxu1 }
 0x125   :  { %v2372_v59 = vpop.f32.mrf.mxu1 }
 0x127   :  { %v2374_v60 = vpop.f32.mrf.mxu1 }
 0x129   :  { %v2376_v62 = vpop.f32.mrf.mxu1 }
 0x12b   :  { %v2378_v1 = vpop.f32.mrf.mxu1 }
 0x12d   :  { %v2380_v3 = vpop.f32.mrf.mxu1 }
 0x12f   :  { %v2382_v5 = vpop.f32.mrf.mxu1 }
 0x131   :  { %v2386_v7 = vpop.f32.mrf.mxu1 }
 0x133   :  { %v2390_v9 = vpop.f32.mrf.mxu1 }
 0x134   :  { %2504 = vst [vmem:[#allocation15_spill] sm:$0xff] %v2390_v9 }
 0x135   :  { %v2394_v11 = vpop.f32.mrf.mxu1 }
 0x136   :  { %2505 = vst [vmem:[#allocation16_spill] sm:$0xff] %v2394_v11 }
 0x137   :  { %v2398_v13 = vpop.f32.mrf.mxu1 }
 0x138   :  { %v519_v61 = vpop.f32.mrf.mxu0  ;;  %2506 = vst [vmem:[#allocation17_spill] sm:$0xff] %v2398_v13 }
 0x139   :  { %v593_v50 = vadd.f32 %v592_v53, %v519_v61 }
 0x13a   :  { %v521_v63 = vpop.f32.mrf.mxu0 }
 0x13b   :  { %v595_v52 = vadd.f32 %v594_v54, %v521_v63 }
 0x13c   :  { %v523_v2 = vpop.f32.mrf.mxu0 }
 0x13e   :  { %v525_v4 = vpop.f32.mrf.mxu0 }
 0x140   :  { %v2384_v6 = vpop.f32.mrf.mxu0 }
 0x141   :  { %v603_v63 = vadd.f32 %v2368_v57, %v2384_v6 }
 0x142   :  { %v2388_v8 = vpop.f32.mrf.mxu0 }
 0x144   :  { %v2392_v10 = vpop.f32.mrf.mxu0 }
 0x145   :  { %v607_v57 = vadd.f32 %v2372_v59, %v2392_v10 }
 0x146   :  { %v2396_v12 = vpop.f32.mrf.mxu0 }
 0x148   :  { %v2400_v0 = vpop.f32.mrf.mxu0 }
 0x149   :  { %v613_v10 = vadd.f32 %v2376_v62, %v2400_v0 }
 0x14a   :  { %v2402_v16 = vpop.f32.mrf.mxu0 }
 0x14c   :  { %v2404_v18 = vpop.f32.mrf.mxu0 }
 0x14e   :  { %v2406_v20 = vpop.f32.mrf.mxu0 }
 0x150   :  { %v2408_v22 = vpop.f32.mrf.mxu0 }
 0x152   :  { %v2410_v24 = vpop.f32.mrf.mxu0 }
 0x153   :  { %2507 = vst [vmem:[#allocation18_spill] sm:$0xff] %v2410_v24  ;;  %v599_v24 = vadd.f32 %v2366_v56, %v525_v4 }
 0x154   :  { %v2414_v26 = vpop.f32.mrf.mxu0 }
 0x155   :  { %2508 = vst [vmem:[#allocation19_spill] sm:$0xff] %v2414_v26  ;;  %v597_v26 = vadd.f32 %v2364_v55, %v523_v2  ;;  %v605_v2 = vadd.f32 %v2370_v58, %v2388_v8  ;;  %v609_v58 = vadd.f32 %v2374_v60, %v2396_v12 }
 0x156   :  { %v2418_v28 = vpop.f32.mrf.mxu0 }
 0x157   :  { %2509 = vst [vmem:[#allocation20_spill] sm:$0xff] %v2418_v28 }
 0x159   :  { %v865_v14 = vpop.f32.mrf.mxu1 }
 0x15a   :  { %v866_v13 = vadd.f32 %v865_v14, %v593_v50 }
 0x15b   :  { %v867_v15 = vpop.f32.mrf.mxu1 }
 0x15d   :  { %v869_v17 = vpop.f32.mrf.mxu1 }
 0x15e   :  { %v870_v42 = vadd.f32 %v869_v17, %v597_v26 }
 0x15f   :  { %v871_v19 = vpop.f32.mrf.mxu1 }
 0x161   :  { %v875_v21 = vpop.f32.mrf.mxu1 }
 0x162   :  { %v876_v56 = vadd.f32 %v875_v21, %v603_v63 }
 0x163   :  { %v877_v23 = vpop.f32.mrf.mxu1 }
 0x164   :  { %v878_v6 = vadd.f32 %v877_v23, %v605_v2 }
 0x165   :  { %v2412_v25 = vpop.f32.mrf.mxu1 }
 0x166   :  { %v880_v8 = vadd.f32 %v2412_v25, %v607_v57  ;;  %v615_v25 = vadd.f32 %v2378_v1, %v2402_v16 }
 0x167   :  { %v2416_v27 = vpop.f32.mrf.mxu1 }
 0x168   :  { %v882_v23 = vadd.f32 %v2416_v27, %v609_v58  ;;  %v617_v27 = vadd.f32 %v2380_v3, %v2404_v18 }
 0x169   :  { %v2420_v29 = vpop.f32.mrf.mxu1 }
 0x16b   :  { %v2422_v31 = vpop.f32.mrf.mxu1 }
 0x16d   :  { %v2424_v33 = vpop.f32.mrf.mxu1 }
 0x16f   :  { %v2426_v35 = vpop.f32.mrf.mxu1 }
 0x170   :  { %2510 = vst [vmem:[#allocation21_spill] sm:$0xff] %v2426_v35 }
 0x171   :  { %v2428_v37 = vpop.f32.mrf.mxu1 }
 0x172   :  { %2511 = vst [vmem:[#allocation22_spill] sm:$0xff] %v2428_v37 }
 0x173   :  { %v2430_v40 = vpop.f32.mrf.mxu1 }
 0x174   :  { %2512 = vst [vmem:[#allocation23_spill] sm:$0xff] %v2430_v40  ;;  %v2439_v40 = vrot.slane %v1546_v48, %v1550_v45  ;;  %v872_v45 = vadd.f32 %v871_v19, %v599_v24 }
 0x175   :  { %v2432_v43 = vpop.f32.mrf.mxu1 }
 0x176   :  { %2513 = vst [vmem:[#allocation24_spill] sm:$0xff] %v2432_v43  ;;  %v2441_v43 = vrot.slane %v1546_v48, %v1554_v49 }
 0x177   :  { %v2434_v46 = vpop.f32.mrf.mxu1 }
 0x178   :  { %v1418_v30 = vpop.f32.mrf.mxu0  ;;  %2514 = vst [vmem:[#allocation25_spill] sm:$0xff] %v2434_v46  ;;  %v868_v46 = vadd.f32 %v867_v15, %v595_v52 }
 0x179   :  { %v2518_v57 = vld [vmem:[#allocation22_spill] sm:$0xff] }
 0x17a   :  { %v1420_v32 = vpop.f32.mrf.mxu0 }
 0x17c   :  { %v1422_v34 = vpop.f32.mrf.mxu0 }
 0x17e   :  { %v1424_v36 = vpop.f32.mrf.mxu0 }
 0x180   :  { %v1428_v38 = vpop.f32.mrf.mxu0 }
 0x182   :  { %v1430_v41 = vpop.f32.mrf.mxu0 }
 0x184   :  { %v1432_v44 = vpop.f32.mrf.mxu0 }
 0x186   :  { %v1434_v47 = vpop.f32.mrf.mxu0 }
 0x188   :  { %v1438_v11 = vpop.f32.mrf.mxu0 }
 0x199   :  { %v1491_v51 = vpop.f32.mrf.mxu1 }
 0x19a   :  { %v1492_v28 = vadd.f32 %v1491_v51, %v1418_v30  ;;  %v1440_v30 = vpop.f32.mrf.mxu0 }
 0x19b   :  { %v1493_v39 = vpop.f32.mrf.mxu1 }
 0x19c   :  { %v1530_v37 = vadd.f32 %v1492_v28, %v866_v13  ;;  %v1494_v9 = vadd.f32 %v1493_v39, %v1420_v32  ;;  %v1442_v24 = vpop.f32.mrf.mxu0 }
 0x19d   :  { %v1495_v35 = vpop.f32.mrf.mxu1 }
 0x19e   :  { %v1531_v53 = vadd.f32 %v1494_v9, %v868_v46  ;;  %v1496_v61 = vadd.f32 %v1495_v35, %v1422_v34  ;;  %v1558_v54 = vadd.f32 %v2439_v40, %v1530_v37  ;;  %v1444_v50 = vpop.f32.mrf.mxu0 }
 0x19f   :  { %v1497_v14 = vpop.f32.mrf.mxu1 }
 0x1a0   :  { %v1532_v48 = vadd.f32 %v1496_v61, %v870_v42  ;;  %v1498_v49 = vadd.f32 %v1497_v14, %v1424_v36  ;;  %v1559_v55 = vadd.f32 %v2441_v43, %v1531_v53  ;;  %v1574_v13 = vmul.f32 %v1558_v54, %v1558_v54  ;;  %v1448_v54 = vpop.f32.mrf.mxu0 }
 0x1a1   :  { %v1501_v4 = vpop.f32.mrf.mxu1 }
 0x1a2   :  { %v1533_v9 = vadd.f32 %v1498_v49, %v872_v45  ;;  %v1502_v15 = vadd.f32 %v1501_v4, %v1428_v38  ;;  %v1575_v17 = vmul.f32 %v1559_v55, %v1559_v55  ;;  %v1560_v26 = vadd.f32 %v2439_v40, %v1532_v48  ;;  %v1450_v4 = vpop.f32.mrf.mxu0 }
 0x1a3   :  { %v1503_v19 = vpop.f32.mrf.mxu1 }
 0x1a4   :  { %v1534_v28 = vadd.f32 %v1502_v15, %v876_v56  ;;  %v1504_v32 = vadd.f32 %v1503_v19, %v1430_v41  ;;  %v1590_v34 = vadd.f32 %v1575_v17, %v1574_v13  ;;  %v1561_v35 = vadd.f32 %v2441_v43, %v1533_v9  ;;  %v2517_v17 = vld [vmem:[#allocation15_spill] sm:$0xff] }
 0x1a5   :  { %v1505_v21 = vpop.f32.mrf.mxu1  ;;  %v1576_v36 = vmul.f32 %v1560_v26, %v1560_v26 }
 0x1a6   :  { %v1535_v37 = vadd.f32 %v1504_v32, %v878_v6  ;;  %v1506_v38 = vadd.f32 %v1505_v21, %v1432_v44  ;;  %1591 = vadd.xlane.f32.xlu0 %v1590_v34  ;;  %v1577_v46 = vmul.f32 %v1561_v35, %v1561_v35  ;;  %v1562_v59 = vadd.f32 %v2439_v40, %v1534_v28  ;;  %v2519_v34 = vld [vmem:[#allocation19_spill] sm:$0xff]  ;;  %v2520_v35 = vld [vmem:[#allocation16_spill] sm:$0xff] }
 0x1a7   :  { %v1507_v41 = vpop.f32.mrf.mxu1  ;;  %v886_v44 = vadd.f32 %v2420_v29, %v613_v10  ;;  %v619_v29 = vadd.f32 %v2382_v5, %v2406_v20  ;;  %v627_v58 = vadd.f32 %v2520_v35, %v2519_v34 }
 0x1a8   :  { %v1536_v51 = vadd.f32 %v1506_v38, %v880_v8  ;;  %v1508_v52 = vadd.f32 %v1507_v41, %v1434_v47  ;;  %v1593_v60 = vadd.f32 %v1577_v46, %v1576_v36  ;;  %v1563_v12 = vadd.f32 %v2441_v43, %v1535_v37  ;;  %v2521_v8 = vld [vmem:[#allocation23_spill] sm:$0xff]  ;;  %v1452_v36 = vpop.f32.mrf.mxu0  ;;  %v2523_v41 = vld [vmem:[#allocation17_spill] sm:$0xff] }
 0x1a9   :  { %v1511_v39 = vpop.f32.mrf.mxu1  ;;  %v1578_v42 = vmul.f32 %v1562_v59, %v1562_v59  ;;  %v888_v47 = vadd.f32 %v2422_v31, %v615_v25  ;;  %v623_v31 = vadd.f32 %v2386_v7, %v2408_v22 }
 0x1aa   :  { %v1537_v53 = vadd.f32 %v1508_v52, %v882_v23  ;;  %v1512_v61 = vadd.f32 %v1511_v39, %v1438_v11  ;;  %1594 = vadd.xlane.f32.xlu0 %v1593_v60  ;;  %v1579_v62 = vmul.f32 %v1563_v12, %v1563_v12  ;;  %v1564_v0 = vadd.f32 %v2439_v40, %v1536_v51  ;;  %v2522_v23 = vld [vmem:[#allocation20_spill] sm:$0xff] }
 0x1ab   :  { %v1513_v63 = vpop.f32.mrf.mxu1  ;;  %v890_v11 = vadd.f32 %v2424_v33, %v617_v27  ;;  %v2516_v33 = vld [vmem:[#allocation18_spill] sm:$0xff]  ;;  %v896_v6 = vadd.f32 %v2518_v57, %v623_v31  ;;  %v2524_v51 = vld [vmem:[#allocation24_spill] sm:$0xff] }
 0x1ac   :  { %v1538_v14 = vadd.f32 %v1512_v61, %v886_v44  ;;  %v1514_v45 = vadd.f32 %v1513_v63, %v1440_v30  ;;  %v1596_v1 = vadd.f32 %v1579_v62, %v1578_v42  ;;  %v1565_v16 = vadd.f32 %v2441_v43, %v1537_v53  ;;  %v2515_v30 = vld [vmem:[#allocation21_spill] sm:$0xff]  ;;  %v1454_v62 = vpop.f32.mrf.mxu0 }
 0x1ad   :  { %v1515_v48 = vpop.f32.mrf.mxu1  ;;  %v1580_v49 = vmul.f32 %v1564_v0, %v1564_v0  ;;  %v892_v56 = vadd.f32 %v2515_v30, %v619_v29  ;;  %v625_v26 = vadd.f32 %v2517_v17, %v2516_v33  ;;  %v900_v52 = vadd.f32 %v2524_v51, %v627_v58  ;;  %v2525_v53 = vld [vmem:[#allocation25_spill] sm:$0xff] }
 0x1ae   :  { %v1539_v55 = vadd.f32 %v1514_v45, %v888_v47  ;;  %v1516_v2 = vadd.f32 %v1515_v48, %v1442_v24  ;;  %1597 = vadd.xlane.f32.xlu1 %v1596_v1  ;;  %v1581_v3 = vmul.f32 %v1565_v16, %v1565_v16  ;;  %v1566_v18 = vadd.f32 %v2439_v40, %v1538_v14 }
 0x1af   :  { %v1517_v13 = vpop.f32.mrf.mxu1  ;;  %v898_v21 = vadd.f32 %v2521_v8, %v625_v26 }
 0x1b0   :  { %v1540_v9 = vadd.f32 %v1516_v2, %v890_v11  ;;  %v1518_v15 = vadd.f32 %v1517_v13, %v1444_v50  ;;  %v1599_v5 = vadd.f32 %v1581_v3, %v1580_v49  ;;  %v1567_v20 = vadd.f32 %v2441_v43, %v1539_v55 }
 0x1b1   :  { %v1521_v19 = vpop.f32.mrf.mxu1  ;;  %v1582_v24 = vmul.f32 %v1566_v18, %v1566_v18  ;;  %v629_v50 = vadd.f32 %v2523_v41, %v2522_v23 }
 0x1b2   :  { %v1541_v28 = vadd.f32 %v1518_v15, %v892_v56  ;;  %v1522_v32 = vadd.f32 %v1521_v19, %v1448_v54  ;;  %1600 = vadd.xlane.f32.xlu1 %v1599_v5  ;;  %v1583_v7 = vmul.f32 %v1567_v20, %v1567_v20  ;;  %v1568_v22 = vadd.f32 %v2439_v40, %v1540_v9 }
 0x1b3   :  { %v1523_v37 = vpop.f32.mrf.mxu1  ;;  %v902_v61 = vadd.f32 %v2525_v53, %v629_v50 }
 0x1b4   :  { %v1542_v38 = vadd.f32 %v1522_v32, %v896_v6  ;;  %v1524_v46 = vadd.f32 %v1523_v37, %v1450_v4  ;;  %v1602_v59 = vadd.f32 %v1583_v7, %v1582_v24  ;;  %v1569_v10 = vadd.f32 %v2441_v43, %v1541_v28 }
 0x1b5   :  { %v1525_v60 = vpop.f32.mrf.mxu1  ;;  %v1584_v12 = vmul.f32 %v1568_v22, %v1568_v22 }
 0x1b6   :  { %v1543_v25 = vadd.f32 %v1524_v46, %v898_v21  ;;  %v1526_v44 = vadd.f32 %v1525_v60, %v1452_v36  ;;  %1603 = vadd.xlane.f32.xlu0 %v1602_v59  ;;  %v1585_v39 = vmul.f32 %v1569_v10, %v1569_v10  ;;  %v1570_v42 = vadd.f32 %v2439_v40, %v1542_v38 }
 0x1b7   :  { %v1527_v0 = vpop.f32.mrf.mxu1 }
 0x1b8   :  { %v1544_v27 = vadd.f32 %v1526_v44, %v900_v52  ;;  %v1528_v47 = vadd.f32 %v1527_v0, %v1454_v62  ;;  %v1605_v54 = vadd.f32 %v1585_v39, %v1584_v12  ;;  %v1571_v63 = vadd.f32 %v2441_v43, %v1543_v25 }
 0x1b9   :  { %v1586_v45 = vmul.f32 %v1570_v42, %v1570_v42 }
 0x1ba   :  { %v1545_v14 = vadd.f32 %v1528_v47, %v902_v61  ;;  %1606 = vadd.xlane.f32.xlu1 %v1605_v54  ;;  %v1587_v1 = vmul.f32 %v1571_v63, %v1571_v63  ;;  %v1572_v16 = vadd.f32 %v2439_v40, %v1544_v27 }
 0x1bc   :  { %v1608_v29 = vadd.f32 %v1587_v1, %v1586_v45  ;;  %v1573_v11 = vadd.f32 %v2441_v43, %v1545_v14  ;;  %v1588_v48 = vmul.f32 %v1572_v16, %v1572_v16 }
 0x1be   :  { %1609 = vadd.xlane.f32.xlu0 %v1608_v29  ;;  %v1589_v49 = vmul.f32 %v1573_v11, %v1573_v11 }
 0x1c0   :  { %v1611_v55 = vadd.f32 %v1589_v49, %v1588_v48 }
 0x1c2   :  { %1612 = vadd.xlane.f32.xlu1 %v1611_v55 }
 0x22f   :  { %v1592_v2 = vpop.xlane.xlu0 %1591 }
 0x230   :  { %2182 = vrsqrt.f32 %v1592_v2  ;;  %vm1616_vm0 = vcmp.eq.f32.partialorder %v1592_v2, inf  ;;  %v1619_v40 = vand.u32 2147483648, %v1592_v2  ;;  %vm1618_vm1 = vcmp.eq.f32.partialorder %v1592_v2, 0.0 }
 0x233   :  { %v1595_v3 = vpop.xlane.xlu0 %1594 }
 0x234   :  { %2184 = vrsqrt.f32 %v1595_v3  ;;  %vm1623_vm2 = vcmp.eq.f32.partialorder %v1595_v3, inf  ;;  %v1626_v20 = vand.u32 2147483648, %v1595_v3  ;;  %vm1625_vm3 = vcmp.eq.f32.partialorder %v1595_v3, 0.0 }
 0x237   :  { %v1598_v18 = vpop.xlane.xlu1 %1597 }
 0x238   :  { %2186 = vrsqrt.f32 %v1598_v18  ;;  %vm1630_vm4 = vcmp.eq.f32.partialorder %v1598_v18, inf  ;;  %v1633_v19 = vand.u32 2147483648, %v1598_v18  ;;  %vm1632_vm5 = vcmp.eq.f32.partialorder %v1598_v18, 0.0 }
 0x23b   :  { %v1601_v31 = vpop.xlane.xlu1 %1600 }
 0x23c   :  { %2188 = vrsqrt.f32 %v1601_v31  ;;  %vm1637_vm6 = vcmp.eq.f32.partialorder %v1601_v31, inf  ;;  %v1640_v34 = vand.u32 2147483648, %v1601_v31  ;;  %vm1639_vm7 = vcmp.eq.f32.partialorder %v1601_v31, 0.0 }
 0x23d   :  { %v2183_v30 = vpop.eup %2182 }
 0x23e   :  { %v1615_v56 = vmul.f32 %v2183_v30, %v1592_v2 }
 0x23f   :  { %v1604_v4 = vpop.xlane.xlu0 %1603 }
 0x240   :  { %2190 = vrsqrt.f32 %v1604_v4  ;;  %v1617_v43 = vsel %vm1616_vm0, %v1592_v2, %v1615_v56  ;;  %vm1644_vm8 = vcmp.eq.f32.partialorder %v1604_v4, inf  ;;  %v1647_v36 = vand.u32 2147483648, %v1604_v4 }
 0x241   :  { %v2185_v13 = vpop.eup %2184  ;;  %v1620_v9 = vsel %vm1618_vm1, %v1619_v40, %v1617_v43  ;;  %vm1646_vm9 = vcmp.eq.f32.partialorder %v1604_v4, 0.0  ;;  %vm1702_vm0 = vcmask 516096  }
 0x242   :  { %1670 = vxpose.xlu0.b32.start [1/8] (short) (narrow) %v1620_v9, 8  ;;  %v1622_v15 = vmul.f32 %v2185_v13, %v1595_v3 }
 0x243   :  { %v1607_v5 = vpop.xlane.xlu1 %1606 }
 0x244   :  { %2192 = vrsqrt.f32 %v1607_v5  ;;  %v1624_v33 = vsel %vm1623_vm2, %v1595_v3, %v1622_v15  ;;  %vm1651_vm10 = vcmp.eq.f32.partialorder %v1607_v5, inf  ;;  %v1654_v10 = vand.u32 2147483648, %v1607_v5 }
 0x245   :  { %v2187_v17 = vpop.eup %2186  ;;  %v1627_v26 = vsel %vm1625_vm3, %v1626_v20, %v1624_v33  ;;  %vm1653_vm11 = vcmp.eq.f32.partialorder %v1607_v5, 0.0 }
 0x246   :  { %1671 = vxpose.xlu0.b32.cont [2/8] (short) (narrow) %v1627_v26, 8  ;;  %v1629_v57 = vmul.f32 %v2187_v17, %v1598_v18 }
 0x247   :  { %v1610_v6 = vpop.xlane.xlu0 %1609 }
 0x248   :  { %2194 = vrsqrt.f32 %v1610_v6  ;;  %v1631_v24 = vsel %vm1630_vm4, %v1598_v18, %v1629_v57  ;;  %vm1658_vm12 = vcmp.eq.f32.partialorder %v1610_v6, inf  ;;  %v1661_v52 = vand.u32 2147483648, %v1610_v6 }
 0x249   :  { %v2189_v28 = vpop.eup %2188  ;;  %v1634_v32 = vsel %vm1632_vm5, %v1633_v19, %v1631_v24  ;;  %vm1660_vm13 = vcmp.eq.f32.partialorder %v1610_v6, 0.0 }
 0x24a   :  { %1672 = vxpose.xlu0.b32.cont [3/8] (short) (narrow) %v1634_v32, 8  ;;  %v1636_v7 = vmul.f32 %v2189_v28, %v1601_v31 }
 0x24b   :  { %v1613_v22 = vpop.xlane.xlu1 %1612 }
 0x24c   :  { %2196 = vrsqrt.f32 %v1613_v22  ;;  %v1638_v35 = vsel %vm1637_vm6, %v1601_v31, %v1636_v7  ;;  %vm1665_vm14 = vcmp.eq.f32.partialorder %v1613_v22, inf  ;;  %v1668_v39 = vand.u32 2147483648, %v1613_v22 }
 0x24d   :  { %v2191_v58 = vpop.eup %2190  ;;  %v1641_v8 = vsel %vm1639_vm7, %v1640_v34, %v1638_v35  ;;  %vm1667_vm15 = vcmp.eq.f32.partialorder %v1613_v22, 0.0 }
 0x24e   :  { %1673 = vxpose.xlu0.b32.cont [4/8] (short) (narrow) %v1641_v8, 8  ;;  %v1643_v21 = vmul.f32 %v2191_v58, %v1604_v4 }
 0x250   :  { %v1645_v37 = vsel %vm1644_vm8, %v1604_v4, %v1643_v21 }
 0x251   :  { %v2193_v38 = vpop.eup %2192  ;;  %v1648_v46 = vsel %vm1646_vm9, %v1647_v36, %v1645_v37 }
 0x252   :  { %1674 = vxpose.xlu0.b32.cont [5/8] (short) (narrow) %v1648_v46, 8  ;;  %v1650_v59 = vmul.f32 %v2193_v38, %v1607_v5 }
 0x254   :  { %v1652_v23 = vsel %vm1651_vm10, %v1607_v5, %v1650_v59 }
 0x255   :  { %v2195_v41 = vpop.eup %2194  ;;  %v1655_v50 = vsel %vm1653_vm11, %v1654_v10, %v1652_v23 }
 0x256   :  { %1675 = vxpose.xlu0.b32.cont [6/8] (short) (narrow) %v1655_v50, 8  ;;  %v1657_v51 = vmul.f32 %v2195_v41, %v1610_v6 }
 0x258   :  { %v1659_v60 = vsel %vm1658_vm12, %v1610_v6, %v1657_v51 }
 0x259   :  { %v2197_v12 = vpop.eup %2196  ;;  %v1662_v25 = vsel %vm1660_vm13, %v1661_v52, %v1659_v60 }
 0x25a   :  { %1676 = vxpose.xlu0.b32.cont [7/8] (short) (narrow) %v1662_v25, 8  ;;  %v1664_v44 = vmul.f32 %v2197_v12, %v1613_v22 }
 0x25c   :  { %v1666_v42 = vsel %vm1665_vm14, %v1613_v22, %v1664_v44 }
 0x25d   :  { %v1669_v53 = vsel %vm1667_vm15, %v1668_v39, %v1666_v42 }
 0x25e   :  { %1677 = vxpose.xlu0.b32.end [8/8] (short) (narrow) %v1669_v53, 8 }
 0x2be   :  { %v1686_v61 = vpop.trf.xlu0 }
 0x2bf   :  { %1703 = vst.msk [vmem:[#allocation10] sm:$0x1] %vm1702_vm0, %v1686_v61 }
 0x2c0   :  { %2289 = shalt.err (!%p2286_p10)
}
 0x2c1   :  { %1713 = dma.vmem_to_hbm [thread:$0]  %s1711_s17, 16, %s2503_s5, [#allocation4]  }
 0x2c2   :  { %2304 = dma.done.wait [#allocation4], 16  }
 0x2c3   :  { %2305 = vsyncadd [#allocation4], 4294967280 }
 0x2c4   :  { %1717 = vsyncpa [#allocation3], 1 }
 0x2c5   :  { %1718 = vsyncpa [#allocation6], 1 }
 0x2c6   :  { %1719 = vsyncpa [#allocation9], 1 }
 0x2c7   :  { %1720 = vsyncpa [#allocation4], 1 }

</bundles_post_ra>
